<compile_context>
chip_gen: v7x
topology: tpu7x:2x2x1
jax: 0.10.0
libtpu: 0.0.40
codegen_flags: <defaults>
</compile_context>

<pallas_src>
import functools

import jax
import jax.numpy as jnp
import numpy as np
from jax.experimental import pallas as pl
from jax.experimental.pallas import tpu as pltpu


def _round_up(n: int, m: int) -> int:
    return ((n + m - 1) // m) * m


# --------------------------------------------------------------------------------------
# Kernel
# --------------------------------------------------------------------------------------
def hidden_layer_kernel(x_ref, c_ref, wx_ref, wc_ref, b_ref, gamma_ref, beta_ref,
                        alpha_ref, out_ref, *, d_out: int, masked: bool):
    """out = PReLU(LayerNorm(concat(x, c) @ W + b)) for one (tb, d_cols) batch tile."""
    # Split-K matmuls == Linear(concat(x, c)).  bf16 operands (cast on-chip), f32 accumulation.
    y = jnp.dot(x_ref[...].astype(jnp.bfloat16), wx_ref[...],
                preferred_element_type=jnp.float32)
    y = y + jnp.dot(c_ref[...].astype(jnp.bfloat16), wc_ref[...],
                    preferred_element_type=jnp.float32)
    y = y + b_ref[...]                                           # (tb, d_cols) + (1, d_cols)

    # One-pass LayerNorm statistics over the REAL d_out columns (mask only if lane-padded).
    inv_n = 1.0 / d_out
    if masked:
        valid = jax.lax.broadcasted_iota(jnp.int32, (1, y.shape[-1]), 1) < d_out
        ym = jnp.where(valid, y, 0.0)
    else:
        ym = y
    mean = jnp.sum(ym, axis=-1, keepdims=True) * inv_n
    var = jnp.maximum(jnp.sum(ym * ym, axis=-1, keepdims=True) * inv_n - mean * mean, 0.0)
    inv_std = jax.lax.rsqrt(var + 1e-5)
    z = (y - mean) * inv_std * gamma_ref[...] + beta_ref[...]    # padded cols stay 0 (gamma/beta=0)

    # PReLU (single learned scalar, torch nn.PReLU() default), fused into the store.
    alpha = alpha_ref[0]
    out_ref[...] = jnp.where(z >= 0.0, z, alpha * z).astype(out_ref.dtype)


# --------------------------------------------------------------------------------------
# One-time parameter preparation (pad + bf16 cast OUTSIDE the per-call path)
# --------------------------------------------------------------------------------------
def prepare_params(params, hidden_dim: int):
    d_in, d_out = params["w"].shape
    embed_dim = d_in - hidden_dim
    d_cols = d_out if d_out % 128 == 0 else _round_up(d_out, 128)   # pad only when needed
    pc = d_cols - d_out

    def row(a):
        return jnp.pad(jnp.asarray(a, jnp.float32).reshape(1, d_out), ((0, 0), (0, pc)))

    return {
        "wx": jnp.pad(params["w"][:hidden_dim], ((0, 0), (0, pc))).astype(jnp.bfloat16),
        "wc": jnp.pad(params["w"][hidden_dim:], ((0, 0), (0, pc))).astype(jnp.bfloat16),
        "b": row(params["b"]),
        "gamma": row(params["gamma"]),
        "beta": row(params["beta"]),
        "alpha": jnp.asarray(params["alpha"], jnp.float32).reshape(1),
        "hidden_dim": hidden_dim, "embed_dim": embed_dim,
        "d_out": d_out, "d_cols": d_cols,
    }


# --------------------------------------------------------------------------------------
# Tile / VMEM sizing
# --------------------------------------------------------------------------------------
def _auto_tb(B, hidden_dim, embed_dim, d_cols, out_itemsize, tb_cap,
             vmem_budget_bytes=48 * 1024 * 1024):
    # Resident (single-buffered) parameters.
    resident = ((hidden_dim + embed_dim) * d_cols * 2     # bf16 W_x + W_c
                + 3 * d_cols * 4 + 4096)                  # bias/gamma/beta + slack
    # Per batch-row cost.
    per_row = (2 * (hidden_dim + embed_dim) * 4           # x/c tiles, double-buffered, f32
               + 2 * d_cols * out_itemsize                # out tile, double-buffered
               + 3 * d_cols * 4)                          # f32 intermediates (y / z / mask)
    tb = (vmem_budget_bytes - resident) // max(per_row, 1)
    tb = max(8, min(int(tb), int(tb_cap), _round_up(B, 8)))
    tb = max(8, (tb // 8) * 8)

    # Prefer an even number of batch blocks (v7x: 2 TensorCores, axis is "parallel").
    nblk = -(-B // tb)
    if nblk % 2 == 1 and B > 8:
        for cand in range(tb, max(8, tb // 2) - 1, -8):
            if (-(-B // cand)) % 2 == 0:
                tb = cand
                break

    vmem_limit = int(1.5 * (resident + per_row * tb)) + (4 << 20)
    vmem_limit = max(16 << 20, min(vmem_limit, 100 << 20))
    return tb, vmem_limit


# --------------------------------------------------------------------------------------
# Forward wrapper
# --------------------------------------------------------------------------------------
def hidden_layer_forward(x, c, prepared, *, tb: int = 512, out_dtype=jnp.bfloat16):
    """x: (B, hidden_dim), c: (B, embed_dim) -> (B, output_dim) in `out_dtype`."""
    B, hidden_dim = x.shape
    _, embed_dim = c.shape
    assert hidden_dim == prepared["hidden_dim"] and embed_dim == prepared["embed_dim"]
    d_out, d_cols = prepared["d_out"], prepared["d_cols"]
    masked = d_cols != d_out

    tb, vmem_limit = _auto_tb(B, hidden_dim, embed_dim, d_cols,
                              jnp.dtype(out_dtype).itemsize, tb)
    grid = (pl.cdiv(B, tb),)
    kernel = functools.partial(hidden_layer_kernel, d_out=d_out, masked=masked)

    def build(single_buffer_params: bool):
        def resident(shape):
            idx = lambda i: (0,) * len(shape)
            if single_buffer_params:
                return pl.BlockSpec(shape, idx, pipeline_mode=pl.Buffered(1))
            return pl.BlockSpec(shape, idx)

        return pl.pallas_call(
            kernel,
            out_shape=jax.ShapeDtypeStruct((B, d_cols), out_dtype),
            grid=grid,
            in_specs=[
                pl.BlockSpec((tb, hidden_dim), lambda i: (i, 0)),   # x tile (f32, cast in kernel)
                pl.BlockSpec((tb, embed_dim), lambda i: (i, 0)),    # c tile (f32, cast in kernel)
                resident((hidden_dim, d_cols)),                     # W_x (bf16), resident
                resident((embed_dim, d_cols)),                      # W_c (bf16), resident
                resident((1, d_cols)),                              # bias
                resident((1, d_cols)),                              # LN gamma
                resident((1, d_cols)),                              # LN beta
                pl.BlockSpec(memory_space=pltpu.MemorySpace.SMEM),  # PReLU alpha (scalar)
            ],
            out_specs=pl.BlockSpec((tb, d_cols), lambda i: (i, 0)),
            compiler_params=pltpu.CompilerParams(
                dimension_semantics=("parallel",),
                vmem_limit_bytes=vmem_limit),
        )

    args = (x, c, prepared["wx"], prepared["wc"], prepared["b"],
            prepared["gamma"], prepared["beta"], prepared["alpha"])
    try:
        out = build(True)(*args)
    except Exception:
        # Older jax without BlockSpec(pipeline_mode=...) support: plain (double-buffered) specs.
        out = build(False)(*args)

    # Column slice only if the feature dim was lane-padded; rows were never padded.
    return out[:, :d_out] if masked else out


# --------------------------------------------------------------------------------------
# Init + references
# --------------------------------------------------------------------------------------
def init_params(key, hidden_dim, embed_dim, output_dim):
    """Mirrors torch defaults (Linear: U(-1/sqrt(fan_in), +), LN gamma=1/beta=0, PReLU=0.25)."""
    d_in = hidden_dim + embed_dim
    k_w, k_b = jax.random.split(key)
    bound = 1.0 / np.sqrt(d_in)
    w = jax.random.uniform(k_w, (d_in, output_dim), jnp.float32, -bound, bound)  # W^T layout
    b = jax.random.uniform(k_b, (output_dim,), jnp.float32, -bound, bound)
    gamma = jnp.ones((output_dim,), jnp.float32)
    beta = jnp.zeros((output_dim,), jnp.float32)
    alpha = jnp.full((1,), 0.25, jnp.float32)
    return {"w": w, "b": b, "gamma": gamma, "beta": beta, "alpha": alpha}


def _layernorm_prelu(y, params):
    mean = jnp.mean(y, axis=-1, keepdims=True)
    var = jnp.mean((y - mean) ** 2, axis=-1, keepdims=True)
    z = (y - mean) * jax.lax.rsqrt(var + 1e-5) * params["gamma"] + params["beta"]
    return jnp.where(z >= 0.0, z, params["alpha"][0] * z)


def reference_forward_f32(x, c, params):
    """Pure-JAX f32 reference of the PyTorch forward (dropout p=0 is identity)."""
    y = jnp.concatenate([x, c], axis=1) @ params["w"] + params["b"]
    return _layernorm_prelu(y, params)


def reference_forward_bf16(x, c, params):
    """Same, but with bf16 matmul operands (matches kernel matmul precision)."""
    x_cat = jnp.concatenate([x.astype(jnp.bfloat16), c.astype(jnp.bfloat16)], axis=1)
    y = jnp.dot(x_cat, params["w"].astype(jnp.bfloat16),
                preferred_element_type=jnp.float32) + params["b"]
    return _layernorm_prelu(y, params)


if __name__ == "__main__":
    hidden_dim, embed_dim, output_dim = 32, 16, 32
    batch = 40

    key = jax.random.PRNGKey(0)
    k_x, k_c, k_p = jax.random.split(key, 3)
    x = jax.random.normal(k_x, (batch, hidden_dim), jnp.float32)
    c = jax.random.normal(k_c, (batch, embed_dim), jnp.float32)
    params = init_params(k_p, hidden_dim, embed_dim, output_dim)

    prepared = prepare_params(params, hidden_dim)   # one-time pad + bf16 cast (out of hot path)

    # tb=16 at this toy size -> 3 batch tiles (incl. one ragged tile), exercising the pipeline.
    out = hidden_layer_forward(x, c, prepared, tb=16)
    out = jax.block_until_ready(out)
    out_f32 = np.asarray(jnp.asarray(out, jnp.float32))

    ref_bf16 = np.asarray(reference_forward_bf16(x, c, params), dtype=np.float32)
    np.testing.assert_allclose(out_f32, ref_bf16, rtol=2e-2, atol=2e-2)

    ref_f32 = np.asarray(reference_forward_f32(x, c, params), dtype=np.float32)
    np.testing.assert_allclose(out_f32, ref_f32, rtol=7e-2, atol=7e-2)

    print("KERNEL_OK")
</pallas_src>

<mosaic_0001>
module attributes {stable_mosaic.version = 11 : i64} {
  func.func @hidden_layer_kernel(%arg0: i32, %arg1: memref<16x32xf32, #tpu.memory_space<vmem>>, %arg2: memref<16x16xf32, #tpu.memory_space<vmem>>, %arg3: memref<32x128xbf16, #tpu.memory_space<vmem>>, %arg4: memref<16x128xbf16, #tpu.memory_space<vmem>>, %arg5: memref<1x128xf32, #tpu.memory_space<vmem>>, %arg6: memref<1x128xf32, #tpu.memory_space<vmem>>, %arg7: memref<1x128xf32, #tpu.memory_space<vmem>>, %arg8: memref<1xf32, #tpu.memory_space<smem>>, %arg9: memref<16x128xbf16, #tpu.memory_space<vmem>>) attributes {dimension_semantics = [#tpu.dimension_semantics<parallel>], iteration_bounds = array<i64: 3>, scalar_prefetch = 0 : i64, scratch_operands = 0 : i64, tpu.core_type = #tpu.core_type<tc>, window_params = [{transform_indices = @transform_0, window_bounds = array<i64: 16, 32>}, {transform_indices = @transform_1, window_bounds = array<i64: 16, 16>}, {pipeline_mode = #tpu.pipeline_mode<synchronous>, transform_indices = @transform_2, window_bounds = array<i64: 32, 128>}, {pipeline_mode = #tpu.pipeline_mode<synchronous>, transform_indices = @transform_3, window_bounds = array<i64: 16, 128>}, {pipeline_mode = #tpu.pipeline_mode<synchronous>, transform_indices = @transform_4, window_bounds = array<i64: 1, 128>}, {pipeline_mode = #tpu.pipeline_mode<synchronous>, transform_indices = @transform_5, window_bounds = array<i64: 1, 128>}, {pipeline_mode = #tpu.pipeline_mode<synchronous>, transform_indices = @transform_6, window_bounds = array<i64: 1, 128>}, {transform_indices = @transform_7, window_bounds = array<i64: 1>}, {transform_indices = @transform_8, window_bounds = array<i64: 16, 128>}]} {
    %c0 = arith.constant 0 : index
    %c0_0 = arith.constant 0 : index
    %0 = vector.load %arg1[%c0, %c0_0] : memref<16x32xf32, #tpu.memory_space<vmem>>, vector<16x32xf32>
    %1 = arith.truncf %0 : vector<16x32xf32> to vector<16x32xbf16>
    %c0_1 = arith.constant 0 : index
    %c0_2 = arith.constant 0 : index
    %2 = vector.load %arg3[%c0_1, %c0_2] : memref<32x128xbf16, #tpu.memory_space<vmem>>, vector<32x128xbf16>
    %cst = arith.constant dense<0.000000e+00> : vector<16x128xf32>
    %3 = tpu.matmul %1, %2, %cst {dimension_numbers = #tpu.dot_dimension_numbers<[1], [0], [0], [1], [0, 0, 1, 1], [], []>} : vector<16x32xbf16>, vector<32x128xbf16>, vector<16x128xf32> -> vector<16x128xf32>
    %c0_3 = arith.constant 0 : index
    %c0_4 = arith.constant 0 : index
    %4 = vector.load %arg2[%c0_3, %c0_4] : memref<16x16xf32, #tpu.memory_space<vmem>>, vector<16x16xf32>
    %5 = arith.truncf %4 : vector<16x16xf32> to vector<16x16xbf16>
    %c0_5 = arith.constant 0 : index
    %c0_6 = arith.constant 0 : index
    %6 = vector.load %arg4[%c0_5, %c0_6] : memref<16x128xbf16, #tpu.memory_space<vmem>>, vector<16x128xbf16>
    %cst_7 = arith.constant dense<0.000000e+00> : vector<16x128xf32>
    %7 = tpu.matmul %5, %6, %cst_7 {dimension_numbers = #tpu.dot_dimension_numbers<[1], [0], [0], [1], [0, 0, 1, 1], [], []>} : vector<16x16xbf16>, vector<16x128xbf16>, vector<16x128xf32> -> vector<16x128xf32>
    %8 = arith.addf %3, %7 : vector<16x128xf32>
    %c0_8 = arith.constant 0 : index
    %c0_9 = arith.constant 0 : index
    %9 = vector.load %arg5[%c0_8, %c0_9] : memref<1x128xf32, #tpu.memory_space<vmem>>, vector<1x128xf32>
    %10 = vector.broadcast %9 : vector<1x128xf32> to vector<16x128xf32>
    %11 = arith.addf %8, %10 : vector<16x128xf32>
    %12 = tpu.iota {dimensions = array<i32: 1>} : vector<1x128xi32>
    %c32_i32 = arith.constant 32 : i32
    %13 = vector.broadcast %c32_i32 : i32 to vector<1x128xi32>
    %14 = arith.cmpi slt, %12, %13 : vector<1x128xi32>
    %cst_10 = arith.constant 0.000000e+00 : f32
    %15 = vector.shape_cast %14 : vector<1x128xi1> to vector<1x128xi1>
    %16 = vector.broadcast %15 : vector<1x128xi1> to vector<16x128xi1>
    %17 = vector.broadcast %cst_10 : f32 to vector<16x128xf32>
    %18 = arith.select %16, %11, %17 : vector<16x128xi1>, vector<16x128xf32>
    %cst_11 = arith.constant dense<0.000000e+00> : vector<16xf32>
    %19 = vector.multi_reduction <add>, %18, %cst_11 [1] : vector<16x128xf32> to vector<16xf32>
    %20 = vector.shape_cast %19 : vector<16xf32> to vector<16x1xf32>
    %cst_12 = arith.constant 3.125000e-02 : f32
    %21 = vector.broadcast %cst_12 : f32 to vector<16x1xf32>
    %22 = arith.mulf %20, %21 : vector<16x1xf32>
    %23 = arith.mulf %18, %18 : vector<16x128xf32>
    %cst_13 = arith.constant dense<0.000000e+00> : vector<16xf32>
    %24 = vector.multi_reduction <add>, %23, %cst_13 [1] : vector<16x128xf32> to vector<16xf32>
    %25 = vector.shape_cast %24 : vector<16xf32> to vector<16x1xf32>
    %cst_14 = arith.constant 3.125000e-02 : f32
    %26 = vector.broadcast %cst_14 : f32 to vector<16x1xf32>
    %27 = arith.mulf %25, %26 : vector<16x1xf32>
    %28 = arith.mulf %22, %22 : vector<16x1xf32>
    %29 = arith.subf %27, %28 : vector<16x1xf32>
    %cst_15 = arith.constant 0.000000e+00 : f32
    %30 = vector.broadcast %cst_15 : f32 to vector<16x1xf32>
    %31 = arith.maximumf %29, %30 : vector<16x1xf32>
    %cst_16 = arith.constant 9.99999974E-6 : f32
    %32 = vector.broadcast %cst_16 : f32 to vector<16x1xf32>
    %33 = arith.addf %31, %32 : vector<16x1xf32>
    %34 = math.rsqrt %33 : vector<16x1xf32>
    %35 = vector.broadcast %22 : vector<16x1xf32> to vector<16x128xf32>
    %36 = arith.subf %11, %35 : vector<16x128xf32>
    %37 = vector.broadcast %34 : vector<16x1xf32> to vector<16x128xf32>
    %38 = arith.mulf %36, %37 : vector<16x128xf32>
    %c0_17 = arith.constant 0 : index
    %c0_18 = arith.constant 0 : index
    %39 = vector.load %arg6[%c0_17, %c0_18] : memref<1x128xf32, #tpu.memory_space<vmem>>, vector<1x128xf32>
    %40 = vector.broadcast %39 : vector<1x128xf32> to vector<16x128xf32>
    %41 = arith.mulf %38, %40 : vector<16x128xf32>
    %c0_19 = arith.constant 0 : index
    %c0_20 = arith.constant 0 : index
    %42 = vector.load %arg7[%c0_19, %c0_20] : memref<1x128xf32, #tpu.memory_space<vmem>>, vector<1x128xf32>
    %43 = vector.broadcast %42 : vector<1x128xf32> to vector<16x128xf32>
    %44 = arith.addf %41, %43 : vector<16x128xf32>
    %c0_21 = arith.constant 0 : index
    %45 = memref.load %arg8[%c0_21] : memref<1xf32, #tpu.memory_space<smem>>
    %cst_22 = arith.constant 0.000000e+00 : f32
    %46 = vector.broadcast %cst_22 : f32 to vector<16x128xf32>
    %47 = arith.cmpf oge, %44, %46 : vector<16x128xf32>
    %48 = vector.broadcast %45 : f32 to vector<16x128xf32>
    %49 = arith.mulf %48, %44 : vector<16x128xf32>
    %50 = arith.select %47, %44, %49 : vector<16x128xi1>, vector<16x128xf32>
    %51 = arith.truncf %50 : vector<16x128xf32> to vector<16x128xbf16>
    %c0_23 = arith.constant 0 : index
    %c0_24 = arith.constant 0 : index
    %52 = vector.load %arg9[%c0_23, %c0_24] : memref<16x128xbf16, #tpu.memory_space<vmem>>, vector<16x128xbf16>
    tpu.vector_store %arg9[%c0_23, %c0_24], %51 {strides = array<i32>} : memref<16x128xbf16, #tpu.memory_space<vmem>>, vector<16x128xbf16>,
    return
  }
  func.func @transform_0(%arg0: i32) -> (i32, i32) {
    %c0_i32 = arith.constant 0 : i32
    %c0_i32_0 = arith.constant 0 : i32
    return %arg0, %c0_i32 : i32, i32
  }
  func.func @transform_1(%arg0: i32) -> (i32, i32) {
    %c0_i32 = arith.constant 0 : i32
    %c0_i32_0 = arith.constant 0 : i32
    return %arg0, %c0_i32 : i32, i32
  }
  func.func @transform_2(%arg0: i32) -> (i32, i32) {
    %c0_i32 = arith.constant 0 : i32
    %c0_i32_0 = arith.constant 0 : i32
    %c0_i32_1 = arith.constant 0 : i32
    return %c0_i32, %c0_i32_0 : i32, i32
  }
  func.func @transform_3(%arg0: i32) -> (i32, i32) {
    %c0_i32 = arith.constant 0 : i32
    %c0_i32_0 = arith.constant 0 : i32
    %c0_i32_1 = arith.constant 0 : i32
    return %c0_i32, %c0_i32_0 : i32, i32
  }
  func.func @transform_4(%arg0: i32) -> (i32, i32) {
    %c0_i32 = arith.constant 0 : i32
    %c0_i32_0 = arith.constant 0 : i32
    %c0_i32_1 = arith.constant 0 : i32
    return %c0_i32, %c0_i32_0 : i32, i32
  }
  func.func @transform_5(%arg0: i32) -> (i32, i32) {
    %c0_i32 = arith.constant 0 : i32
    %c0_i32_0 = arith.constant 0 : i32
    %c0_i32_1 = arith.constant 0 : i32
    return %c0_i32, %c0_i32_0 : i32, i32
  }
  func.func @transform_6(%arg0: i32) -> (i32, i32) {
    %c0_i32 = arith.constant 0 : i32
    %c0_i32_0 = arith.constant 0 : i32
    %c0_i32_1 = arith.constant 0 : i32
    return %c0_i32, %c0_i32_0 : i32, i32
  }
  func.func @transform_7(%arg0: i32) -> i32 {
    %c0_i32 = arith.constant 0 : i32
    %c0_i32_0 = arith.constant 0 : i32
    return %c0_i32 : i32
  }
  func.func @transform_8(%arg0: i32) -> (i32, i32) {
    %c0_i32 = arith.constant 0 : i32
    %c0_i32_0 = arith.constant 0 : i32
    return %arg0, %c0_i32 : i32, i32
  }
}

module attributes {stable_mosaic.version = 11 : i64} {
  func.func @hidden_layer_kernel(%arg0: i32, %arg1: memref<16x32xf32, #tpu.memory_space<vmem>>, %arg2: memref<16x16xf32, #tpu.memory_space<vmem>>, %arg3: memref<32x128xbf16, #tpu.memory_space<vmem>>, %arg4: memref<16x128xbf16, #tpu.memory_space<vmem>>, %arg5: memref<1x128xf32, #tpu.memory_space<vmem>>, %arg6: memref<1x128xf32, #tpu.memory_space<vmem>>, %arg7: memref<1x128xf32, #tpu.memory_space<vmem>>, %arg8: memref<1xf32, #tpu.memory_space<smem>>, %arg9: memref<16x128xbf16, #tpu.memory_space<vmem>>) attributes {dimension_semantics = [#tpu.dimension_semantics<parallel>], iteration_bounds = array<i64: 3>, scalar_prefetch = 0 : i64, scratch_operands = 0 : i64, tpu.core_type = #tpu.core_type<tc>, window_params = [{transform_indices = @transform_0, window_bounds = array<i64: 16, 32>}, {transform_indices = @transform_1, window_bounds = array<i64: 16, 16>}, {pipeline_mode = #tpu.pipeline_mode<synchronous>, transform_indices = @transform_2, window_bounds = array<i64: 32, 128>}, {pipeline_mode = #tpu.pipeline_mode<synchronous>, transform_indices = @transform_3, window_bounds = array<i64: 16, 128>}, {pipeline_mode = #tpu.pipeline_mode<synchronous>, transform_indices = @transform_4, window_bounds = array<i64: 1, 128>}, {pipeline_mode = #tpu.pipeline_mode<synchronous>, transform_indices = @transform_5, window_bounds = array<i64: 1, 128>}, {pipeline_mode = #tpu.pipeline_mode<synchronous>, transform_indices = @transform_6, window_bounds = array<i64: 1, 128>}, {transform_indices = @transform_7, window_bounds = array<i64: 1>}, {transform_indices = @transform_8, window_bounds = array<i64: 16, 128>}]} {
    %c0 = arith.constant 0 : index
    %c0_0 = arith.constant 0 : index
    %0 = vector.load %arg1[%c0, %c0_0] : memref<16x32xf32, #tpu.memory_space<vmem>>, vector<16x32xf32>
    %1 = arith.truncf %0 : vector<16x32xf32> to vector<16x32xbf16>
    %c0_1 = arith.constant 0 : index
    %c0_2 = arith.constant 0 : index
    %2 = vector.load %arg3[%c0_1, %c0_2] : memref<32x128xbf16, #tpu.memory_space<vmem>>, vector<32x128xbf16>
    %cst = arith.constant dense<0.000000e+00> : vector<16x128xf32>
    %3 = tpu.matmul %1, %2, %cst {dimension_numbers = #tpu.dot_dimension_numbers<[1], [0], [0], [1], [0, 0, 1, 1], [], []>} : vector<16x32xbf16>, vector<32x128xbf16>, vector<16x128xf32> -> vector<16x128xf32>
    %c0_3 = arith.constant 0 : index
    %c0_4 = arith.constant 0 : index
    %4 = vector.load %arg2[%c0_3, %c0_4] : memref<16x16xf32, #tpu.memory_space<vmem>>, vector<16x16xf32>
    %5 = arith.truncf %4 : vector<16x16xf32> to vector<16x16xbf16>
    %c0_5 = arith.constant 0 : index
    %c0_6 = arith.constant 0 : index
    %6 = vector.load %arg4[%c0_5, %c0_6] : memref<16x128xbf16, #tpu.memory_space<vmem>>, vector<16x128xbf16>
    %cst_7 = arith.constant dense<0.000000e+00> : vector<16x128xf32>
    %7 = tpu.matmul %5, %6, %cst_7 {dimension_numbers = #tpu.dot_dimension_numbers<[1], [0], [0], [1], [0, 0, 1, 1], [], []>} : vector<16x16xbf16>, vector<16x128xbf16>, vector<16x128xf32> -> vector<16x128xf32>
    %8 = arith.addf %3, %7 : vector<16x128xf32>
    %c0_8 = arith.constant 0 : index
    %c0_9 = arith.constant 0 : index
    %9 = vector.load %arg5[%c0_8, %c0_9] : memref<1x128xf32, #tpu.memory_space<vmem>>, vector<1x128xf32>
    %10 = vector.broadcast %9 : vector<1x128xf32> to vector<16x128xf32>
    %11 = arith.addf %8, %10 : vector<16x128xf32>
    %12 = tpu.iota {dimensions = array<i32: 1>} : vector<1x128xi32>
    %c32_i32 = arith.constant 32 : i32
    %13 = vector.broadcast %c32_i32 : i32 to vector<1x128xi32>
    %14 = arith.cmpi slt, %12, %13 : vector<1x128xi32>
    %cst_10 = arith.constant 0.000000e+00 : f32
    %15 = vector.shape_cast %14 : vector<1x128xi1> to vector<1x128xi1>
    %16 = vector.broadcast %15 : vector<1x128xi1> to vector<16x128xi1>
    %17 = vector.broadcast %cst_10 : f32 to vector<16x128xf32>
    %18 = arith.select %16, %11, %17 : vector<16x128xi1>, vector<16x128xf32>
    %cst_11 = arith.constant dense<0.000000e+00> : vector<16xf32>
    %19 = vector.multi_reduction <add>, %18, %cst_11 [1] : vector<16x128xf32> to vector<16xf32>
    %20 = vector.shape_cast %19 : vector<16xf32> to vector<16x1xf32>
    %cst_12 = arith.constant 3.125000e-02 : f32
    %21 = vector.broadcast %cst_12 : f32 to vector<16x1xf32>
    %22 = arith.mulf %20, %21 : vector<16x1xf32>
    %23 = arith.mulf %18, %18 : vector<16x128xf32>
    %cst_13 = arith.constant dense<0.000000e+00> : vector<16xf32>
    %24 = vector.multi_reduction <add>, %23, %cst_13 [1] : vector<16x128xf32> to vector<16xf32>
    %25 = vector.shape_cast %24 : vector<16xf32> to vector<16x1xf32>
    %cst_14 = arith.constant 3.125000e-02 : f32
    %26 = vector.broadcast %cst_14 : f32 to vector<16x1xf32>
    %27 = arith.mulf %25, %26 : vector<16x1xf32>
    %28 = arith.mulf %22, %22 : vector<16x1xf32>
    %29 = arith.subf %27, %28 : vector<16x1xf32>
    %cst_15 = arith.constant 0.000000e+00 : f32
    %30 = vector.broadcast %cst_15 : f32 to vector<16x1xf32>
    %31 = arith.maximumf %29, %30 : vector<16x1xf32>
    %cst_16 = arith.constant 9.99999974E-6 : f32
    %32 = vector.broadcast %cst_16 : f32 to vector<16x1xf32>
    %33 = arith.addf %31, %32 : vector<16x1xf32>
    %34 = math.rsqrt %33 : vector<16x1xf32>
    %35 = vector.broadcast %22 : vector<16x1xf32> to vector<16x128xf32>
    %36 = arith.subf %11, %35 : vector<16x128xf32>
    %37 = vector.broadcast %34 : vector<16x1xf32> to vector<16x128xf32>
    %38 = arith.mulf %36, %37 : vector<16x128xf32>
    %c0_17 = arith.constant 0 : index
    %c0_18 = arith.constant 0 : index
    %39 = vector.load %arg6[%c0_17, %c0_18] : memref<1x128xf32, #tpu.memory_space<vmem>>, vector<1x128xf32>
    %40 = vector.broadcast %39 : vector<1x128xf32> to vector<16x128xf32>
    %41 = arith.mulf %38, %40 : vector<16x128xf32>
    %c0_19 = arith.constant 0 : index
    %c0_20 = arith.constant 0 : index
    %42 = vector.load %arg7[%c0_19, %c0_20] : memref<1x128xf32, #tpu.memory_space<vmem>>, vector<1x128xf32>
    %43 = vector.broadcast %42 : vector<1x128xf32> to vector<16x128xf32>
    %44 = arith.addf %41, %43 : vector<16x128xf32>
    %c0_21 = arith.constant 0 : index
    %45 = memref.load %arg8[%c0_21] : memref<1xf32, #tpu.memory_space<smem>>
    %cst_22 = arith.constant 0.000000e+00 : f32
    %46 = vector.broadcast %cst_22 : f32 to vector<16x128xf32>
    %47 = arith.cmpf oge, %44, %46 : vector<16x128xf32>
    %48 = vector.broadcast %45 : f32 to vector<16x128xf32>
    %49 = arith.mulf %48, %44 : vector<16x128xf32>
    %50 = arith.select %47, %44, %49 : vector<16x128xi1>, vector<16x128xf32>
    %51 = arith.truncf %50 : vector<16x128xf32> to vector<16x128xbf16>
    %c0_23 = arith.constant 0 : index
    %c0_24 = arith.constant 0 : index
    %52 = vector.load %arg9[%c0_23, %c0_24] : memref<16x128xbf16, #tpu.memory_space<vmem>>, vector<16x128xbf16>
    tpu.vector_store %arg9[%c0_23, %c0_24], %51 {strides = array<i32>} : memref<16x128xbf16, #tpu.memory_space<vmem>>, vector<16x128xbf16>,
    return
  }
  func.func @transform_0(%arg0: i32) -> (i32, i32) {
    %c0_i32 = arith.constant 0 : i32
    %c0_i32_0 = arith.constant 0 : i32
    return %arg0, %c0_i32 : i32, i32
  }
  func.func @transform_1(%arg0: i32) -> (i32, i32) {
    %c0_i32 = arith.constant 0 : i32
    %c0_i32_0 = arith.constant 0 : i32
    return %arg0, %c0_i32 : i32, i32
  }
  func.func @transform_2(%arg0: i32) -> (i32, i32) {
    %c0_i32 = arith.constant 0 : i32
    %c0_i32_0 = arith.constant 0 : i32
    %c0_i32_1 = arith.constant 0 : i32
    return %c0_i32, %c0_i32_0 : i32, i32
  }
  func.func @transform_3(%arg0: i32) -> (i32, i32) {
    %c0_i32 = arith.constant 0 : i32
    %c0_i32_0 = arith.constant 0 : i32
    %c0_i32_1 = arith.constant 0 : i32
    return %c0_i32, %c0_i32_0 : i32, i32
  }
  func.func @transform_4(%arg0: i32) -> (i32, i32) {
    %c0_i32 = arith.constant 0 : i32
    %c0_i32_0 = arith.constant 0 : i32
    %c0_i32_1 = arith.constant 0 : i32
    return %c0_i32, %c0_i32_0 : i32, i32
  }
  func.func @transform_5(%arg0: i32) -> (i32, i32) {
    %c0_i32 = arith.constant 0 : i32
    %c0_i32_0 = arith.constant 0 : i32
    %c0_i32_1 = arith.constant 0 : i32
    return %c0_i32, %c0_i32_0 : i32, i32
  }
  func.func @transform_6(%arg0: i32) -> (i32, i32) {
    %c0_i32 = arith.constant 0 : i32
    %c0_i32_0 = arith.constant 0 : i32
    %c0_i32_1 = arith.constant 0 : i32
    return %c0_i32, %c0_i32_0 : i32, i32
  }
  func.func @transform_7(%arg0: i32) -> i32 {
    %c0_i32 = arith.constant 0 : i32
    %c0_i32_0 = arith.constant 0 : i32
    return %c0_i32 : i32
  }
  func.func @transform_8(%arg0: i32) -> (i32, i32) {
    %c0_i32 = arith.constant 0 : i32
    %c0_i32_0 = arith.constant 0 : i32
    return %arg0, %c0_i32 : i32, i32
  }
}

</mosaic_0001>

<bundles_post_ra>
// kernel: tpu_custom_call.1
= control target key start
LH: loop header
LB: loop body
LE: loop exit
PB: predicated region body
PF: predicated region fallthrough
CT: control target
= control target key end

     0   :  { %s1032_s0 = inlined_call_operand.vmem [shape: f32[40,32], index: 0, kind: input, shape index: {}]   ;;  %s1033_s1 = inlined_call_operand.vmem [shape: f32[40,16], index: 1, kind: input, shape index: {}]   ;;  %s1034_s2 = inlined_call_operand.vmem [shape: bf16[32,128], index: 2, kind: input, shape index: {}]   ;;  %s1035_s3 = inlined_call_operand.vmem [shape: bf16[16,128], index: 3, kind: input, shape index: {}]   ;;  %s1036_s4 = inlined_call_operand.vmem [shape: f32[1,128], index: 4, kind: input, shape index: {}]   ;;  %s1037_s5 = inlined_call_operand.vmem [shape: f32[1,128], index: 5, kind: input, shape index: {}]   ;;  %s1038_s6 = inlined_call_operand.vmem [shape: f32[1,128], index: 6, kind: input, shape index: {}]   ;;  %s1039_s7 = inlined_call_operand.<no memory space> [shape: f32[1], index: 7, kind: input, shape index: {}]   ;;  %s1040_s8 = inlined_call_operand.hbm [shape: bf16[40,128], index: 8, kind: output, shape index: {}]  }
   0x1   :  { %13 = sst [smem:[#allocation2]] %s1039_s7 }
   0x2   :  { %14 = vsyncpa [#allocation4], 0 }
   0x3   :  { %16 = vsyncpa [#allocation4 + $0x1], 0  ;;  %s890_s29 = smov 0   ;;  %s892_s30 = smov 0  }
   0x4   :  { %s894_s9 = smov 0   ;;  %s896_s10 = smov 0  }
   0x5 LB: > { %s911_s7 = sadd.s32 4294967295, %s835_s10   ;;  %s669_s11 = sadd.s32 4294967294, %s835_s10   ;;  %s835_s10 = sphi %s896_s10, %s1046_s10   ;;  %s831_s9 = sphi %s894_s9, %s1045_s9   ;;  %s827_s30 = sphi %s892_s30, %s1044_s30   ;;  %s823_s29 = sphi %s890_s29, %s1043_s29  }
   0x6   : > { %s915_s12 = sadd.s32 1, %s835_s10   ;;  %s207_s13 = sadd.s32 1, %s831_s9 }
   0x7   : > { %s204_s14 = ssub.s32 %s835_s10, %s915_s12  ;;  %p217_p0 = scmp.ne.s32.totalorder %s831_s9, %s827_s30 }
   0x8   : > { %p205_p1 = scmp.eq.s32.totalorder %s204_s14, 0  ;;  %p218_p2 = scmp.eq.s32.totalorder %s911_s7, 2 }
   0x9   : > { %p223_p3 = scmp.ne.s32.totalorder %s827_s30, %s823_s29  ;;  %p224_p4 = scmp.eq.s32.totalorder %s669_s11, 2 }
   0xa   : > { %s926_s15 = scalar_select %p205_p1, %s831_s9, %s207_s13  }
   0xb   : > { %p928_p5 = por %p218_p2, %p217_p0  ;;  %p932_p6 = por %p224_p4, %p223_p3 }
   0xc   : > { %p672_p7 = scmp.ge.s32.totalorder %s835_s10, 1  ;;  %p294_p8 = scmp.lt.s32.totalorder %s835_s10, 4 }
   0xe   : > { %p295_p9 = pnand %p672_p7, %p294_p8 }
   0xf   : > { %v766_v0 = vld [vmem:[%s1034_s2] sm:$0xff] (!%p295_p9)   ;;  %v837_v1 = vmov (!%p295_p9), 0.0   ;;  %v768_v3 = vld [vmem:[%s1034_s2 + $0x8] sm:$0xff] (!%p295_p9)   ;;  %vm838_vm0 = vmmov (!%p295_p9), 0   ;;  %s948_s24 = sshll.u32 (!%p295_p9), %s911_s7, 1  ;;  %vm393_vm1 = vcmask (!%p295_p9), 130048   ;;  %v504_v10 = vlaneseq (!%p295_p9) }
  0x10   : > { %298 = sbr.rel (%p295_p9) target bundleno = 455 (0x1c7), region = 52  ;;  %716 = vmatprep.subr.bf16.mxu1 (!%p295_p9), %v837_v1  ;;  %710 = vmatprep.subr.bf16.mxu0 (!%p295_p9), %v837_v1  ;;  %v767_v2 = vld [vmem:[%s1035_s3] sm:$0xff] (!%p295_p9)   ;;  %p346_p10 = scmp.lt.s32.totalorder (!%p295_p9), %s948_s24, 4  ;;  %vm450_vm2 = vcmask (!%p295_p9), 261120  }
  0x11   : > { %717 = vmatpush3.bf16.msra.mxu1 (!%p295_p9), %v766_v0  ;;  %712 = vmatprep.mubr.msk.bf16.mxu0 (!%p295_p9), %vm838_vm0, %v837_v1  ;;  %v505_v11 = vand.u32 (!%p295_p9), 127, %v504_v10  ;;  %v683_v15 = vld [vmem:[%s1036_s4] ss:$0 sm:$0xff] (!%p295_p9)  ;;  %s338_s21 = sand.u32 (!%p295_p9), 1, %s827_s30   ;;  %s557_s22 = sld [smem:[#allocation2]] (!%p295_p9) }
  0x12   : > { %718 = vmatprep.subr.bf16.mxu1 (!%p295_p9), %v837_v1  ;;  %711 = vmatpush3.bf16.msra.mxu0 (!%p295_p9), %v767_v2  ;;  %v684_v47 = vld [vmem:[%s1037_s5] ss:$0 sm:$0xff] (!%p295_p9)  ;;  %s673_s28 = sshll.u32 (!%p295_p9), %s338_s21, 3  ;;  %s972_s13 = scalar_lea.sflag (!%p295_p9), [#allocation4], %s338_s21 }
  0x13   : > { %720 = vmatprep.mubr.msk.bf16.mxu1 (!%p295_p9), %vm838_vm0, %v837_v1  ;;  %vm506_vm3 = vcmp.lt.s32.totalorder (!%p295_p9), %v505_v11, 32  ;;  %v685_v49 = vld [vmem:[%s1038_s6] ss:$0 sm:$0xff] (!%p295_p9) }
  0x15   : > { %719 = vmatpush3.bf16.msra.mxu1 (!%p295_p9), %v768_v3 }
  0x17   : > { %s347_s25 = scalar_select %p346_p10, %s948_s24, 4  ;;  %v560_v55 = vstv %s557_s22 }
  0x18   : > { %s584_s14 = ssub.s32 (%p928_p5), 5, %s948_s24 }
  0x19   : > { %s675_s26 = sshll.u32 %s347_s25, 3  ;;  %p585_p11 = scmp.lt.s32.totalorder (%p928_p5), %s584_s14, 2 }
  0x1a   : > { %s363_s11 = scalar_lea.vmem %s1033_s1, %s675_s26  ;;  %s349_s18 = scalar_lea.vmem %s1032_s0, %s675_s26 }
  0x1b   : > { %v382_v4 = vld [vmem:[%s363_s11] sm:$0xff]  ;;  %v383_v5 = vld [vmem:[%s363_s11 + $0x8] sm:$0xff]  ;;  %s340_s11 = scalar_lea.vmem [#allocation3], %s673_s28 }
  0x1c   : > { %v375_v6 = vld [vmem:[%s349_s18] sm:$0xff]  ;;  %v384_v7 = vpack.c.bf16 %v383_v5, %v382_v4  ;;  %v376_v8 = vld [vmem:[%s349_s18 + $0x8] sm:$0xff] }
  0x1d   : > { %v377_v9 = vpack.c.bf16 %v376_v8, %v375_v6 }
  0x1e   : > { %713 = vmatmul.mubr.msk.bf16.vlgmr.msra.gmra.mrb[0].mxu0 %vm393_vm1, %v384_v7 }
  0x1f   : > { %721 = vmatmul.mubr.msk.bf16.vlgmr.msra.gmra.mrb[0].mxu1 %vm450_vm2, %v377_v9 }
  0xf1   : > { %v431_v12 = vpop.f32.mrb[0].mxu0 }
  0xf2   : > { %v488_v13 = vpop.f32.mrb[0].mxu1  ;;  %v714_v14 = vpop.f32.mrb[1].mxu0 }
  0xf3   : > { %v489_v16 = vadd.f32 %v488_v13, %v431_v12  ;;  %v722_v17 = vpop.f32.mrb[1].mxu1  ;;  %v434_v18 = vpop.f32.mrb[2].mxu0 }
  0xf4   : > { %v491_v19 = vpop.f32.mrb[2].mxu1  ;;  %v715_v20 = vpop.f32.mrb[3].mxu0 }
  0xf5   : > { %v492_v21 = vadd.f32 %v491_v19, %v434_v18  ;;  %v723_v22 = vpop.f32.mrb[3].mxu1  ;;  %v502_v23 = vadd.f32 %v683_v15, %v489_v16 }
  0xf7   : > { %v509_v24 = vsel %vm506_vm3, %v502_v23, 0.0  ;;  %v503_v25 = vadd.f32 %v683_v15, %v492_v21 }
  0xf8   : > { %511 = vadd.xlane.f32.xlu0 %v509_v24  ;;  %v517_v26 = vmul.f32 %v509_v24, %v509_v24 }
  0xf9   : > { %v510_v27 = vsel %vm506_vm3, %v503_v25, 0.0 }
  0xfa   : > { %519 = vadd.xlane.f32.xlu1 %v517_v26  ;;  %v518_v28 = vmul.f32 %v510_v27, %v510_v27 }
  0xfc   : > { %513 = vadd.xlane.f32.xlu0 %v510_v27 }
  0xfe   : > { %521 = vadd.xlane.f32.xlu1 %v518_v28 }
 0x185   : > { %v512_v29 = vpop.xlane.xlu0 %511 }
 0x186   : > { %v515_v30 = vmul.f32 0.03125, %v512_v29 }
 0x187   : > { %v520_v31 = vpop.xlane.xlu1 %519 }
 0x188   : > { %v525_v32 = vmul.f32 %v515_v30, %v515_v30  ;;  %v523_v33 = vmul.f32 0.03125, %v520_v31  ;;  %v535_v45 = vsub.f32 %v502_v23, %v515_v30 }
 0x189   : > { %v514_v34 = vpop.xlane.xlu0 %513 }
 0x18a   : > { %v527_v35 = vsub.f32 %v523_v33, %v525_v32  ;;  %v516_v36 = vmul.f32 0.03125, %v514_v34 }
 0x18b   : > { %v522_v37 = vpop.xlane.xlu1 %521 }
 0x18c   : > { %v529_v38 = vmax.f32 %v527_v35, 0.0  ;;  %v526_v39 = vmul.f32 %v516_v36, %v516_v36  ;;  %v524_v40 = vmul.f32 0.03125, %v522_v37  ;;  %v536_v51 = vsub.f32 %v503_v25, %v516_v36 }
 0x18e   : > { %v531_v41 = vadd.f32 1e-05, %v529_v38  ;;  %v528_v42 = vsub.f32 %v524_v40, %v526_v39 }
 0x190   : > { %769 = vrsqrt.f32 %v531_v41  ;;  %v530_v43 = vmax.f32 %v528_v42, 0.0 }
 0x192   : > { %v532_v44 = vadd.f32 1e-05, %v530_v43 }
 0x194   : > { %771 = vrsqrt.f32 %v532_v44 }
 0x19a   : > { %v770_v46 = vpop.eup %769 }
 0x19b   : > { %v537_v48 = vmul.f32 %v770_v46, %v535_v45 }
 0x19d   : > { %v546_v50 = vmul.f32 %v684_v47, %v537_v48 }
 0x19e   : > { %v772_v52 = vpop.eup %771 }
 0x19f   : > { %v555_v53 = vadd.f32 %v685_v49, %v546_v50  ;;  %v538_v54 = vmul.f32 %v772_v52, %v536_v51 }
 0x1a1   : > { %v547_v56 = vmul.f32 %v684_v47, %v538_v54  ;;  %v561_v57 = vmul.f32 %v560_v55, %v555_v53  ;;  %vm558_vm4 = vcmp.ge.f32.partialorder %v555_v53, 0.0 }
 0x1a3   : > { %v556_v58 = vadd.f32 %v685_v49, %v547_v56  ;;  %v563_v60 = vsel %vm558_vm4, %v555_v53, %v561_v57 }
 0x1a4   : > { %582 = sbr.rel (!%p928_p5) target bundleno = 455 (0x1c7), region = 56 }
 0x1a5   : > { %vm559_vm5 = vcmp.ge.f32.partialorder %v556_v58, 0.0  ;;  %v562_v59 = vmul.f32 %v560_v55, %v556_v58 }
 0x1a7   : > { %v564_v61 = vsel %vm559_vm5, %v556_v58, %v562_v59 }
 0x1a8   : > { %v703_v62 = vpack.c.bf16 %v564_v61, %v563_v60 }
 0x1aa   : > { %704 = vst [vmem:[%s340_s11] sm:$0xff] %v703_v62  }
 0x1ab   : > { %s1048_s14 = smov (!%p585_p11, %s584_s14), 2 }
 0x1ac   : > { %s977_s18 = sshll.u32 %s1048_s14, 6 }
 0x1ad   : > { %s589_s19 = ssub.s32 128, %s977_s18 }
 0x1ae   : > { %590 = vsyncadd %s972_s13, %s589_s19  ;;  %p691_p12 = scmp.ne.s32.totalorder %s977_s18, 0  ;;  %s699_s20 = sshll.u32 %s911_s7, 7 }
 0x1af   : > { %s986_s16 = scalar_lea.hbm %s1040_s8, %s699_s20  ;;  %s595_s23 = sshll.u32 %s340_s11, 4  ;;  %s988_s23 = int_to_ptr.vmem [resolvable:$true] %s595_s23 }
 0x1b0   : > { %s773_s24 = scalar_lea.vmem %s988_s23, %s977_s18  ;;  %s839_s25 = smov [#allocation3]  }
 0x1b1   : > { %p774_p13 = scmp.ne.s32.totalorder %s988_s23, %s773_s24  ;;  %s777_s26 = sshll.u32 %s839_s25, 4  ;;  %s778_s26 = int_to_ptr.vmem [resolvable:$false] %s777_s26 }
 0x1b2   : > { %s779_s7 = scalar_lea.vmem %s778_s26, 256  ;;  %p780_p2 = scmp.lt.s32.totalorder %s988_s23, %s778_s26 }
 0x1b3   : > { %p775_p0 = pnand %p774_p13, %p691_p12  ;;  %p781_p3 = scmp.lt.s32.totalorder %s779_s7, %s773_s24 }
 0x1b5   : > { %p776_p1 = pneg %p775_p0  ;;  %p782_p4 = por %p781_p3, %p780_p2 }
 0x1b7   : > { %p783_p5 = pnand %p782_p4, %p776_p1 }
 0x1b9   : > { %786 = shalt.err (!%p783_p5)
}
 0x1ba   : > { %s787_s27 = scalar_lea.hbm %s986_s16, %s977_s18  ;;  %s791_s14 = scalar_lea.hbm %s1040_s8, 320 }
 0x1bb   : > { %p788_p7 = scmp.ne.s32.totalorder %s986_s16, %s787_s27  ;;  %p792_p10 = scmp.lt.u32.totalorder %s986_s16, %s1040_s8 }
 0x1bc   : > { %p793_p11 = scmp.lt.u32.totalorder %s791_s14, %s787_s27  ;;  %p795_p0 = scmp.lt.u32.totalorder %s787_s27, %s986_s16 }
 0x1bd   : > { %p789_p8 = pnand %p788_p7, %p691_p12 }
 0x1be   : > { %p794_p13 = por %p793_p11, %p792_p10 }
 0x1bf   : > { %p790_p9 = pneg %p789_p8 }
 0x1c0   : > { %p796_p1 = por %p795_p0, %p794_p13 }
 0x1c2   : > { %p797_p2 = pnand %p796_p1, %p790_p9 }
 0x1c4   : > { %800 = shalt.err (!%p797_p2)
}
 0x1c5   : > { %s840_s21 = smov 64   ;;  %s841_s22 = smov 4  }
 0x1c6   : > { %601 = dma.vmem_to_hbm [thread:$0]  (%p691_p12), %s988_s23, %s977_s18, %s986_s16, %s972_s13, %s840_s21, %s840_s21, %s841_s22  }
 0x1c7 PF: > { %p729_p3 = scmp.ge.s32.totalorder %s835_s10, 2  ;;  %s610_s24 = sand.u32 1, %s823_s29  }
 0x1c8   : > { %s611_s25 = scalar_lea.sflag [#allocation4], %s610_s24 }
 0x1c9   : > { %p726_p4 = pnand %p729_p3, %p932_p6 }
 0x1cb   : > { %818 = dma.done.wait (!%p726_p4), %s611_s25, 128  }
 0x1cc   : > { %820 = vsyncadd (!%p726_p4), %s611_s25, 4294967168  ;;  %p19_p5 = scmp.ge.s32.totalorder %s915_s12, 5   ;;  %s1043_s29 = smov %s827_s30 }
 0x1cd   : > { %s1044_s30 = smov %s831_s9  ;;  %s1045_s9 = smov %s926_s15 }
 0x1ce   : > { %s1046_s10 = smov %s915_s12  ;;  %21 = sbr.rel (!%p19_p5) target bundleno = 5 (0x5), region = 90 }
 0x1d5   :  { %616 = vsyncpa [#allocation4], 1 }
 0x1d6   :  { %618 = vsyncpa [#allocation4 + $0x1], 1 }

// kernel: tpu_custom_call.1
= control target key start
LH: loop header
LB: loop body
LE: loop exit
PB: predicated region body
PF: predicated region fallthrough
CT: control target
= control target key end

     0   :  { %s1032_s0 = inlined_call_operand.vmem [shape: f32[40,32], index: 0, kind: input, shape index: {}]   ;;  %s1033_s1 = inlined_call_operand.vmem [shape: f32[40,16], index: 1, kind: input, shape index: {}]   ;;  %s1034_s2 = inlined_call_operand.vmem [shape: bf16[32,128], index: 2, kind: input, shape index: {}]   ;;  %s1035_s3 = inlined_call_operand.vmem [shape: bf16[16,128], index: 3, kind: input, shape index: {}]   ;;  %s1036_s4 = inlined_call_operand.vmem [shape: f32[1,128], index: 4, kind: input, shape index: {}]   ;;  %s1037_s5 = inlined_call_operand.vmem [shape: f32[1,128], index: 5, kind: input, shape index: {}]   ;;  %s1038_s6 = inlined_call_operand.vmem [shape: f32[1,128], index: 6, kind: input, shape index: {}]   ;;  %s1039_s7 = inlined_call_operand.<no memory space> [shape: f32[1], index: 7, kind: input, shape index: {}]   ;;  %s1040_s8 = inlined_call_operand.hbm [shape: bf16[40,128], index: 8, kind: output, shape index: {}]  }
   0x1   :  { %13 = sst [smem:[#allocation2]] %s1039_s7 }
   0x2   :  { %14 = vsyncpa [#allocation4], 0 }
   0x3   :  { %16 = vsyncpa [#allocation4 + $0x1], 0  ;;  %s890_s29 = smov 0   ;;  %s892_s30 = smov 0  }
   0x4   :  { %s894_s9 = smov 0   ;;  %s896_s10 = smov 0  }
   0x5 LB: > { %s911_s7 = sadd.s32 4294967295, %s835_s10   ;;  %s669_s11 = sadd.s32 4294967294, %s835_s10   ;;  %s835_s10 = sphi %s896_s10, %s1046_s10   ;;  %s831_s9 = sphi %s894_s9, %s1045_s9   ;;  %s827_s30 = sphi %s892_s30, %s1044_s30   ;;  %s823_s29 = sphi %s890_s29, %s1043_s29  }
   0x6   : > { %s915_s12 = sadd.s32 1, %s835_s10   ;;  %s207_s13 = sadd.s32 1, %s831_s9 }
   0x7   : > { %s204_s14 = ssub.s32 %s835_s10, %s915_s12  ;;  %p217_p0 = scmp.ne.s32.totalorder %s831_s9, %s827_s30 }
   0x8   : > { %p205_p1 = scmp.eq.s32.totalorder %s204_s14, 0  ;;  %p218_p2 = scmp.eq.s32.totalorder %s911_s7, 2 }
   0x9   : > { %p223_p3 = scmp.ne.s32.totalorder %s827_s30, %s823_s29  ;;  %p224_p4 = scmp.eq.s32.totalorder %s669_s11, 2 }
   0xa   : > { %s926_s15 = scalar_select %p205_p1, %s831_s9, %s207_s13  }
   0xb   : > { %p928_p5 = por %p218_p2, %p217_p0  ;;  %p932_p6 = por %p224_p4, %p223_p3 }
   0xc   : > { %p672_p7 = scmp.ge.s32.totalorder %s835_s10, 1  ;;  %p294_p8 = scmp.lt.s32.totalorder %s835_s10, 4 }
   0xe   : > { %p295_p9 = pnand %p672_p7, %p294_p8 }
   0xf   : > { %v766_v0 = vld [vmem:[%s1034_s2] sm:$0xff] (!%p295_p9)   ;;  %v837_v1 = vmov (!%p295_p9), 0.0   ;;  %v768_v3 = vld [vmem:[%s1034_s2 + $0x8] sm:$0xff] (!%p295_p9)   ;;  %vm838_vm0 = vmmov (!%p295_p9), 0   ;;  %s948_s24 = sshll.u32 (!%p295_p9), %s911_s7, 1  ;;  %vm393_vm1 = vcmask (!%p295_p9), 130048   ;;  %v504_v10 = vlaneseq (!%p295_p9) }
  0x10   : > { %298 = sbr.rel (%p295_p9) target bundleno = 455 (0x1c7), region = 52  ;;  %716 = vmatprep.subr.bf16.mxu1 (!%p295_p9), %v837_v1  ;;  %710 = vmatprep.subr.bf16.mxu0 (!%p295_p9), %v837_v1  ;;  %v767_v2 = vld [vmem:[%s1035_s3] sm:$0xff] (!%p295_p9)   ;;  %p346_p10 = scmp.lt.s32.totalorder (!%p295_p9), %s948_s24, 4  ;;  %vm450_vm2 = vcmask (!%p295_p9), 261120  }
  0x11   : > { %717 = vmatpush3.bf16.msra.mxu1 (!%p295_p9), %v766_v0  ;;  %712 = vmatprep.mubr.msk.bf16.mxu0 (!%p295_p9), %vm838_vm0, %v837_v1  ;;  %v505_v11 = vand.u32 (!%p295_p9), 127, %v504_v10  ;;  %v683_v15 = vld [vmem:[%s1036_s4] ss:$0 sm:$0xff] (!%p295_p9)  ;;  %s338_s21 = sand.u32 (!%p295_p9), 1, %s827_s30   ;;  %s557_s22 = sld [smem:[#allocation2]] (!%p295_p9) }
  0x12   : > { %718 = vmatprep.subr.bf16.mxu1 (!%p295_p9), %v837_v1  ;;  %711 = vmatpush3.bf16.msra.mxu0 (!%p295_p9), %v767_v2  ;;  %v684_v47 = vld [vmem:[%s1037_s5] ss:$0 sm:$0xff] (!%p295_p9)  ;;  %s673_s28 = sshll.u32 (!%p295_p9), %s338_s21, 3  ;;  %s972_s13 = scalar_lea.sflag (!%p295_p9), [#allocation4], %s338_s21 }
  0x13   : > { %720 = vmatprep.mubr.msk.bf16.mxu1 (!%p295_p9), %vm838_vm0, %v837_v1  ;;  %vm506_vm3 = vcmp.lt.s32.totalorder (!%p295_p9), %v505_v11, 32  ;;  %v685_v49 = vld [vmem:[%s1038_s6] ss:$0 sm:$0xff] (!%p295_p9) }
  0x15   : > { %719 = vmatpush3.bf16.msra.mxu1 (!%p295_p9), %v768_v3 }
  0x17   : > { %s347_s25 = scalar_select %p346_p10, %s948_s24, 4  ;;  %v560_v55 = vstv %s557_s22 }
  0x18   : > { %s584_s14 = ssub.s32 (%p928_p5), 5, %s948_s24 }
  0x19   : > { %s675_s26 = sshll.u32 %s347_s25, 3  ;;  %p585_p11 = scmp.lt.s32.totalorder (%p928_p5), %s584_s14, 2 }
  0x1a   : > { %s363_s11 = scalar_lea.vmem %s1033_s1, %s675_s26  ;;  %s349_s18 = scalar_lea.vmem %s1032_s0, %s675_s26 }
  0x1b   : > { %v382_v4 = vld [vmem:[%s363_s11] sm:$0xff]  ;;  %v383_v5 = vld [vmem:[%s363_s11 + $0x8] sm:$0xff]  ;;  %s340_s11 = scalar_lea.vmem [#allocation3], %s673_s28 }
  0x1c   : > { %v375_v6 = vld [vmem:[%s349_s18] sm:$0xff]  ;;  %v384_v7 = vpack.c.bf16 %v383_v5, %v382_v4  ;;  %v376_v8 = vld [vmem:[%s349_s18 + $0x8] sm:$0xff] }
  0x1d   : > { %v377_v9 = vpack.c.bf16 %v376_v8, %v375_v6 }
  0x1e   : > { %713 = vmatmul.mubr.msk.bf16.vlgmr.msra.gmra.mrb[0].mxu0 %vm393_vm1, %v384_v7 }
  0x1f   : > { %721 = vmatmul.mubr.msk.bf16.vlgmr.msra.gmra.mrb[0].mxu1 %vm450_vm2, %v377_v9 }
  0xf1   : > { %v431_v12 = vpop.f32.mrb[0].mxu0 }
  0xf2   : > { %v488_v13 = vpop.f32.mrb[0].mxu1  ;;  %v714_v14 = vpop.f32.mrb[1].mxu0 }
  0xf3   : > { %v489_v16 = vadd.f32 %v488_v13, %v431_v12  ;;  %v722_v17 = vpop.f32.mrb[1].mxu1  ;;  %v434_v18 = vpop.f32.mrb[2].mxu0 }
  0xf4   : > { %v491_v19 = vpop.f32.mrb[2].mxu1  ;;  %v715_v20 = vpop.f32.mrb[3].mxu0 }
  0xf5   : > { %v492_v21 = vadd.f32 %v491_v19, %v434_v18  ;;  %v723_v22 = vpop.f32.mrb[3].mxu1  ;;  %v502_v23 = vadd.f32 %v683_v15, %v489_v16 }
  0xf7   : > { %v509_v24 = vsel %vm506_vm3, %v502_v23, 0.0  ;;  %v503_v25 = vadd.f32 %v683_v15, %v492_v21 }
  0xf8   : > { %511 = vadd.xlane.f32.xlu0 %v509_v24  ;;  %v517_v26 = vmul.f32 %v509_v24, %v509_v24 }
  0xf9   : > { %v510_v27 = vsel %vm506_vm3, %v503_v25, 0.0 }
  0xfa   : > { %519 = vadd.xlane.f32.xlu1 %v517_v26  ;;  %v518_v28 = vmul.f32 %v510_v27, %v510_v27 }
  0xfc   : > { %513 = vadd.xlane.f32.xlu0 %v510_v27 }
  0xfe   : > { %521 = vadd.xlane.f32.xlu1 %v518_v28 }
 0x185   : > { %v512_v29 = vpop.xlane.xlu0 %511 }
 0x186   : > { %v515_v30 = vmul.f32 0.03125, %v512_v29 }
 0x187   : > { %v520_v31 = vpop.xlane.xlu1 %519 }
 0x188   : > { %v525_v32 = vmul.f32 %v515_v30, %v515_v30  ;;  %v523_v33 = vmul.f32 0.03125, %v520_v31  ;;  %v535_v45 = vsub.f32 %v502_v23, %v515_v30 }
 0x189   : > { %v514_v34 = vpop.xlane.xlu0 %513 }
 0x18a   : > { %v527_v35 = vsub.f32 %v523_v33, %v525_v32  ;;  %v516_v36 = vmul.f32 0.03125, %v514_v34 }
 0x18b   : > { %v522_v37 = vpop.xlane.xlu1 %521 }
 0x18c   : > { %v529_v38 = vmax.f32 %v527_v35, 0.0  ;;  %v526_v39 = vmul.f32 %v516_v36, %v516_v36  ;;  %v524_v40 = vmul.f32 0.03125, %v522_v37  ;;  %v536_v51 = vsub.f32 %v503_v25, %v516_v36 }
 0x18e   : > { %v531_v41 = vadd.f32 1e-05, %v529_v38  ;;  %v528_v42 = vsub.f32 %v524_v40, %v526_v39 }
 0x190   : > { %769 = vrsqrt.f32 %v531_v41  ;;  %v530_v43 = vmax.f32 %v528_v42, 0.0 }
 0x192   : > { %v532_v44 = vadd.f32 1e-05, %v530_v43 }
 0x194   : > { %771 = vrsqrt.f32 %v532_v44 }
 0x19a   : > { %v770_v46 = vpop.eup %769 }
 0x19b   : > { %v537_v48 = vmul.f32 %v770_v46, %v535_v45 }
 0x19d   : > { %v546_v50 = vmul.f32 %v684_v47, %v537_v48 }
 0x19e   : > { %v772_v52 = vpop.eup %771 }
 0x19f   : > { %v555_v53 = vadd.f32 %v685_v49, %v546_v50  ;;  %v538_v54 = vmul.f32 %v772_v52, %v536_v51 }
 0x1a1   : > { %v547_v56 = vmul.f32 %v684_v47, %v538_v54  ;;  %v561_v57 = vmul.f32 %v560_v55, %v555_v53  ;;  %vm558_vm4 = vcmp.ge.f32.partialorder %v555_v53, 0.0 }
 0x1a3   : > { %v556_v58 = vadd.f32 %v685_v49, %v547_v56  ;;  %v563_v60 = vsel %vm558_vm4, %v555_v53, %v561_v57 }
 0x1a4   : > { %582 = sbr.rel (!%p928_p5) target bundleno = 455 (0x1c7), region = 56 }
 0x1a5   : > { %vm559_vm5 = vcmp.ge.f32.partialorder %v556_v58, 0.0  ;;  %v562_v59 = vmul.f32 %v560_v55, %v556_v58 }
 0x1a7   : > { %v564_v61 = vsel %vm559_vm5, %v556_v58, %v562_v59 }
 0x1a8   : > { %v703_v62 = vpack.c.bf16 %v564_v61, %v563_v60 }
 0x1aa   : > { %704 = vst [vmem:[%s340_s11] sm:$0xff] %v703_v62  }
 0x1ab   : > { %s1048_s14 = smov (!%p585_p11, %s584_s14), 2 }
 0x1ac   : > { %s977_s18 = sshll.u32 %s1048_s14, 6 }
 0x1ad   : > { %s589_s19 = ssub.s32 128, %s977_s18 }
 0x1ae   : > { %590 = vsyncadd %s972_s13, %s589_s19  ;;  %p691_p12 = scmp.ne.s32.totalorder %s977_s18, 0  ;;  %s699_s20 = sshll.u32 %s911_s7, 7 }
 0x1af   : > { %s986_s16 = scalar_lea.hbm %s1040_s8, %s699_s20  ;;  %s595_s23 = sshll.u32 %s340_s11, 4  ;;  %s988_s23 = int_to_ptr.vmem [resolvable:$true] %s595_s23 }
 0x1b0   : > { %s773_s24 = scalar_lea.vmem %s988_s23, %s977_s18  ;;  %s839_s25 = smov [#allocation3]  }
 0x1b1   : > { %p774_p13 = scmp.ne.s32.totalorder %s988_s23, %s773_s24  ;;  %s777_s26 = sshll.u32 %s839_s25, 4  ;;  %s778_s26 = int_to_ptr.vmem [resolvable:$false] %s777_s26 }
 0x1b2   : > { %s779_s7 = scalar_lea.vmem %s778_s26, 256  ;;  %p780_p2 = scmp.lt.s32.totalorder %s988_s23, %s778_s26 }
 0x1b3   : > { %p775_p0 = pnand %p774_p13, %p691_p12  ;;  %p781_p3 = scmp.lt.s32.totalorder %s779_s7, %s773_s24 }
 0x1b5   : > { %p776_p1 = pneg %p775_p0  ;;  %p782_p4 = por %p781_p3, %p780_p2 }
 0x1b7   : > { %p783_p5 = pnand %p782_p4, %p776_p1 }
 0x1b9   : > { %786 = shalt.err (!%p783_p5)
}
 0x1ba   : > { %s787_s27 = scalar_lea.hbm %s986_s16, %s977_s18  ;;  %s791_s14 = scalar_lea.hbm %s1040_s8, 320 }
 0x1bb   : > { %p788_p7 = scmp.ne.s32.totalorder %s986_s16, %s787_s27  ;;  %p792_p10 = scmp.lt.u32.totalorder %s986_s16, %s1040_s8 }
 0x1bc   : > { %p793_p11 = scmp.lt.u32.totalorder %s791_s14, %s787_s27  ;;  %p795_p0 = scmp.lt.u32.totalorder %s787_s27, %s986_s16 }
 0x1bd   : > { %p789_p8 = pnand %p788_p7, %p691_p12 }
 0x1be   : > { %p794_p13 = por %p793_p11, %p792_p10 }
 0x1bf   : > { %p790_p9 = pneg %p789_p8 }
 0x1c0   : > { %p796_p1 = por %p795_p0, %p794_p13 }
 0x1c2   : > { %p797_p2 = pnand %p796_p1, %p790_p9 }
 0x1c4   : > { %800 = shalt.err (!%p797_p2)
}
 0x1c5   : > { %s840_s21 = smov 64   ;;  %s841_s22 = smov 4  }
 0x1c6   : > { %601 = dma.vmem_to_hbm [thread:$0]  (%p691_p12), %s988_s23, %s977_s18, %s986_s16, %s972_s13, %s840_s21, %s840_s21, %s841_s22  }
 0x1c7 PF: > { %p729_p3 = scmp.ge.s32.totalorder %s835_s10, 2  ;;  %s610_s24 = sand.u32 1, %s823_s29  }
 0x1c8   : > { %s611_s25 = scalar_lea.sflag [#allocation4], %s610_s24 }
 0x1c9   : > { %p726_p4 = pnand %p729_p3, %p932_p6 }
 0x1cb   : > { %818 = dma.done.wait (!%p726_p4), %s611_s25, 128  }
 0x1cc   : > { %820 = vsyncadd (!%p726_p4), %s611_s25, 4294967168  ;;  %p19_p5 = scmp.ge.s32.totalorder %s915_s12, 5   ;;  %s1043_s29 = smov %s827_s30 }
 0x1cd   : > { %s1044_s30 = smov %s831_s9  ;;  %s1045_s9 = smov %s926_s15 }
 0x1ce   : > { %s1046_s10 = smov %s915_s12  ;;  %21 = sbr.rel (!%p19_p5) target bundleno = 5 (0x5), region = 90 }
 0x1d5   :  { %616 = vsyncpa [#allocation4], 1 }
 0x1d6   :  { %618 = vsyncpa [#allocation4 + $0x1], 1 }

</bundles_post_ra>
